<compile_context>
chip_gen: v6e
topology: v6e:2x2x1
jax: 0.10.0
libtpu: 0.0.40
codegen_flags: <defaults>
</compile_context>

<pallas_src>
import jax
import jax.numpy as jnp
from jax.experimental import pallas as pl
from jax.experimental.pallas import tpu as pltpu

# synthetic "config" (the original reads these from a global config dict)
CONFIG = {
    "n_year_bk": 16,
    "n_author": 64,
    "n_publisher": 24,
}


def _bk_item_loading_kernel(idx_ref, tbl_ref, out_ref):
    """Fused gather: one combined one-hot (three 1s/row) @ block-diag table.

    idx_ref: (BM, 3) int32 in VMEM, columns = [author, year, publisher], each
             already offset into the packed table's row space (disjoint ranges).
    tbl_ref: (V_pad, C_pad) f32 in VMEM
             (year cols [0:D], author [D:2D], publisher [2D:3D], zero pad after)
    out_ref: (BM, C_pad) f32 in VMEM -- full lane-dense slab store.
    """
    bm = idx_ref.shape[0]
    v_pad = tbl_ref.shape[0]

    idx = idx_ref[...]                                                 # (BM, 3)
    iota = jax.lax.broadcasted_iota(jnp.int32, (bm, v_pad), 1)         # (BM, V_pad)

    # Offsets were pre-added in the wrapper and indices clamped per-table, so
    # the three ranges are disjoint: OR-ing the compares gives the combined
    # one-hot with exactly three 1s per row.
    onehot = ((iota == idx[:, 0:1])
              | (iota == idx[:, 1:2])
              | (iota == idx[:, 2:3])).astype(jnp.float32)             # (BM, V_pad)

    # Single MXU matmul + single unmasked 128-lane store of the whole tile.
    out_ref[...] = jnp.dot(onehot, tbl_ref[...],
                           preferred_element_type=jnp.float32)


def _pack_combined_table(emb_year, emb_author, emb_publisher):
    """Pack the three tables into one block-diagonal (V_pad, C_pad) f32 table.

    C_pad = 3*D rounded up to 128 lanes (lane-dense output);
    V_pad = total vocab rounded up to 128 (clean MXU contraction dim).
    """
    D = emb_year.shape[1]
    vy, va, vp = emb_year.shape[0], emb_author.shape[0], emb_publisher.shape[0]
    v_total = vy + va + vp
    v_pad = 128 * pl.cdiv(v_total, 128)
    c_pad = 128 * pl.cdiv(3 * D, 128)

    tbl = jnp.zeros((v_pad, c_pad), jnp.float32)
    tbl = tbl.at[0:vy, 0:D].set(emb_year.astype(jnp.float32))              # year      -> cols [0:D]
    tbl = tbl.at[vy:vy + va, D:2 * D].set(emb_author.astype(jnp.float32))  # author    -> cols [D:2D]
    tbl = tbl.at[vy + va:v_total, 2 * D:3 * D].set(
        emb_publisher.astype(jnp.float32))                                 # publisher -> cols [2D:3D]

    # Row offsets applied to x2 columns (author, year, publisher) in the wrapper.
    offsets = jnp.array([vy, 0, vy + va], jnp.int32)
    # Per-column clamp bound (author, year, publisher) to keep indices inside
    # their own table's rows (torch.nn.Embedding would raise on OOB instead).
    clamp_max = jnp.array([va - 1, vy - 1, vp - 1], jnp.int32)
    return tbl, offsets, clamp_max, D


def make_bk_item_loading(emb_year, emb_author, emb_publisher, *, block_b=512):
    """Packs the embedding tables ONCE and returns a jitted forward(x2).

    forward(x2): x2 is (B, 3) int [author, year, publisher]; returns (B, 3*D) f32.
    """
    tbl, offsets, clamp_max, D = _pack_combined_table(
        emb_year, emb_author, emb_publisher)
    v_pad, c_pad = tbl.shape

    def forward(x2):
        B = x2.shape[0]

        # Clamp each column to its own vocab, then pre-add packed-table row
        # offsets so the kernel does bare compares.
        x2i = jnp.clip(x2.astype(jnp.int32), 0, clamp_max) + offsets

        # Batch tile: multiple of 8 sublanes, capped at block_b.
        bm = min(block_b, 8 * pl.cdiv(B, 8))
        # v7x: make sure a large batch yields >= 2 grid steps so both
        # TensorCores get work under dimension_semantics=("parallel",).
        if B > 256 and pl.cdiv(B, bm) < 2:
            bm = 8 * pl.cdiv(pl.cdiv(B, 2), 8)
        b_pad = bm * pl.cdiv(B, bm)
        if b_pad != B:
            # index 0 (year row 0) is always valid; padded rows are sliced off.
            x2i = jnp.pad(x2i, ((0, b_pad - B), (0, 0)))

        out = pl.pallas_call(
            _bk_item_loading_kernel,
            out_shape=jax.ShapeDtypeStruct((b_pad, c_pad), jnp.float32),
            grid=(b_pad // bm,),
            in_specs=[
                pl.BlockSpec((bm, 3), lambda i: (i, 0)),          # index tile (pipelined)
                pl.BlockSpec((v_pad, c_pad), lambda i: (0, 0)),   # packed table: VMEM-resident
            ],
            out_specs=pl.BlockSpec((bm, c_pad), lambda i: (i, 0)),
            compiler_params=pltpu.CompilerParams(
                dimension_semantics=("parallel",)),               # v7x: split batch over 2 TCs
        )(x2i, tbl)

        if b_pad != B or c_pad != 3 * D:
            out = out[:B, :3 * D]
        return out

    return jax.jit(forward)


def bk_item_loading_ref(x2, emb_year, emb_author, emb_publisher):
    """Pure-JAX reference for verification (matches the torch forward)."""
    author_idx, year_idx, publisher_idx = x2[:, 0], x2[:, 1], x2[:, 2]
    return jnp.concatenate(
        [emb_year[year_idx], emb_author[author_idx], emb_publisher[publisher_idx]],
        axis=1,
    )


if __name__ == "__main__":
    embedding_dim = 32
    B = 8

    key = jax.random.PRNGKey(0)
    k_year, k_author, k_pub, k_idx = jax.random.split(key, 4)

    # deterministic parameter init (torch.nn.Embedding default is N(0,1))
    emb_year = jax.random.normal(k_year, (CONFIG["n_year_bk"], embedding_dim), jnp.float32)
    emb_author = jax.random.normal(k_author, (CONFIG["n_author"], embedding_dim), jnp.float32)
    emb_publisher = jax.random.normal(k_pub, (CONFIG["n_publisher"], embedding_dim), jnp.float32)

    # x2[:, 0] = author idx, x2[:, 1] = year idx, x2[:, 2] = publisher idx
    author_idx = jax.random.randint(k_idx, (B, 1), 0, CONFIG["n_author"])
    year_idx = jax.random.randint(jax.random.fold_in(k_idx, 1), (B, 1), 0, CONFIG["n_year_bk"])
    pub_idx = jax.random.randint(jax.random.fold_in(k_idx, 2), (B, 1), 0, CONFIG["n_publisher"])
    x2 = jnp.concatenate([author_idx, year_idx, pub_idx], axis=1).astype(jnp.int32)

    # Pack tables once at "module init"; reuse the returned forward per call.
    bk_item_loading = make_bk_item_loading(emb_year, emb_author, emb_publisher)

    out = bk_item_loading(x2)
    out = jax.block_until_ready(out)

    ref = bk_item_loading_ref(x2, emb_year, emb_author, emb_publisher)
    assert out.shape == (B, 3 * embedding_dim)
    assert jnp.allclose(out, ref, atol=1e-5, rtol=1e-5)

    print("KERNEL_OK")
</pallas_src>

<mosaic_0001>
module attributes {stable_mosaic.version = 11 : i64} {
  func.func @_bk_item_loading_kernel(%arg0: i32, %arg1: memref<8x3xi32, #tpu.memory_space<vmem>>, %arg2: memref<128x128xf32, #tpu.memory_space<vmem>>, %arg3: memref<8x128xf32, #tpu.memory_space<vmem>>) attributes {dimension_semantics = [#tpu.dimension_semantics<parallel>], iteration_bounds = array<i64: 1>, scalar_prefetch = 0 : i64, scratch_operands = 0 : i64, tpu.core_type = #tpu.core_type<tc>, window_params = [{transform_indices = @transform_0, window_bounds = array<i64: 8, 3>}, {pipeline_mode = #tpu.pipeline_mode<synchronous>, transform_indices = @transform_1, window_bounds = array<i64: 128, 128>}, {transform_indices = @transform_2, window_bounds = array<i64: 8, 128>}]} {
    %c0 = arith.constant 0 : index
    %c0_0 = arith.constant 0 : index
    %0 = vector.load %arg1[%c0, %c0_0] : memref<8x3xi32, #tpu.memory_space<vmem>>, vector<8x3xi32>
    %1 = tpu.iota {dimensions = array<i32: 1>} : vector<8x128xi32>
    %2 = vector.extract_strided_slice %0 {offsets = [0, 0], sizes = [8, 1], strides = [1, 1]} : vector<8x3xi32> to vector<8x1xi32>
    %3 = vector.broadcast %2 : vector<8x1xi32> to vector<8x128xi32>
    %4 = arith.cmpi eq, %1, %3 : vector<8x128xi32>
    %5 = vector.extract_strided_slice %0 {offsets = [0, 1], sizes = [8, 1], strides = [1, 1]} : vector<8x3xi32> to vector<8x1xi32>
    %6 = vector.broadcast %5 : vector<8x1xi32> to vector<8x128xi32>
    %7 = arith.cmpi eq, %1, %6 : vector<8x128xi32>
    %8 = arith.ori %4, %7 : vector<8x128xi1>
    %9 = vector.extract_strided_slice %0 {offsets = [0, 2], sizes = [8, 1], strides = [1, 1]} : vector<8x3xi32> to vector<8x1xi32>
    %10 = vector.broadcast %9 : vector<8x1xi32> to vector<8x128xi32>
    %11 = arith.cmpi eq, %1, %10 : vector<8x128xi32>
    %12 = arith.ori %8, %11 : vector<8x128xi1>
    %13 = arith.extui %12 : vector<8x128xi1> to vector<8x128xi32>
    %14 = arith.sitofp %13 : vector<8x128xi32> to vector<8x128xf32>
    %c0_1 = arith.constant 0 : index
    %c0_2 = arith.constant 0 : index
    %15 = vector.load %arg2[%c0_1, %c0_2] : memref<128x128xf32, #tpu.memory_space<vmem>>, vector<128x128xf32>
    %cst = arith.constant dense<0.000000e+00> : vector<8x128xf32>
    %16 = tpu.matmul %14, %15, %cst {dimension_numbers = #tpu.dot_dimension_numbers<[1], [0], [0], [1], [0, 0, 1, 1], [], []>} : vector<8x128xf32>, vector<128x128xf32>, vector<8x128xf32> -> vector<8x128xf32>
    %c0_3 = arith.constant 0 : index
    %c0_4 = arith.constant 0 : index
    %17 = vector.load %arg3[%c0_3, %c0_4] : memref<8x128xf32, #tpu.memory_space<vmem>>, vector<8x128xf32>
    tpu.vector_store %arg3[%c0_3, %c0_4], %16 {strides = array<i32>} : memref<8x128xf32, #tpu.memory_space<vmem>>, vector<8x128xf32>,
    return
  }
  func.func @transform_0(%arg0: i32) -> (i32, i32) {
    %c0_i32 = arith.constant 0 : i32
    %c0_i32_0 = arith.constant 0 : i32
    return %arg0, %c0_i32 : i32, i32
  }
  func.func @transform_1(%arg0: i32) -> (i32, i32) {
    %c0_i32 = arith.constant 0 : i32
    %c0_i32_0 = arith.constant 0 : i32
    %c0_i32_1 = arith.constant 0 : i32
    return %c0_i32, %c0_i32_0 : i32, i32
  }
  func.func @transform_2(%arg0: i32) -> (i32, i32) {
    %c0_i32 = arith.constant 0 : i32
    %c0_i32_0 = arith.constant 0 : i32
    return %arg0, %c0_i32 : i32, i32
  }
}

</mosaic_0001>

<bundles_post_ra>
// kernel: forward.1
= control target key start
LH: loop header
LB: loop body
LE: loop exit
PB: predicated region body
PF: predicated region fallthrough
CT: control target
= control target key end

     0   :  { %7 = vsyncpa [#allocation3], 0  ;;  %s293_s0 = inlined_call_operand.vmem [shape: s32[8,3], index: 0, kind: input, shape index: {}]   ;;  %s294_s1 = inlined_call_operand.hbm [shape: f32[128,128], index: 1, kind: input, shape index: {}]   ;;  %s295_s2 = inlined_call_operand.hbm [shape: f32[8,128], index: 2, kind: output, shape index: {}]  }
   0x1   :  { %8 = vsyncpa [#allocation4], 0  ;;  %s259_s9 = smov [#allocation2]  }
   0x2   :  { %s16_s10 = sshll.u32 %s259_s9, 4  ;;  %s17_s10 = int_to_ptr.vmem [resolvable:$true] %s16_s10 }
   0x3   :  { %s223_s11 = scalar_lea.vmem %s17_s10, 2048  ;;  %p228_p1 = scmp.lt.s32.totalorder %s17_s10, %s17_s10 }
   0x4   :  { %p224_p0 = scmp.ne.s32.totalorder %s17_s10, %s223_s11  ;;  %p229_p2 = scmp.lt.s32.totalorder %s223_s11, %s223_s11 }
   0x6   :  { %p230_p3 = por %p229_p2, %p228_p1 }
   0x8   :  { %p231_p4 = pnand %p230_p3, %p224_p0 }
   0xa   :  { %234 = shalt.err (!%p231_p4)
}
   0xb   :  { %s260_s12 = smov 128   ;;  %s261_s13 = smov 8  }
   0xc   :  { %22 = dma.hbm_to_vmem [thread:$0]  %s294_s1, 2048, %s17_s10, [#allocation3], %s260_s12, %s260_s12, %s261_s13  }
   0xd   :  { %255 = dma.done.wait [#allocation3], 2048  }
   0xe   :  { %256 = vsyncadd [#allocation3], 4294965248  ;;  %v262_v0 = vmov 0   ;;  %v263_v1 = vmov 2   ;;  %v264_v2 = vmov 0.0   ;;  %v26_v3 = vld [vmem:[%s293_s0] sm:$0xff]  ;;  %v27_v21 = vlaneseq }
   0xf   :  { %211 = vset.pattern.permute.xlu0 %v262_v0  ;;  %213 = vset.pattern.permute.xlu1 %v263_v1  ;;  %v60_v4 = vld [vmem:[#allocation2 + $0x78] sm:$0xff]  ;;  %v59_v5 = vld [vmem:[#allocation2 + $0x70] sm:$0xff]  ;;  %v58_v6 = vld [vmem:[#allocation2 + $0x68] sm:$0xff]  ;;  %vm265_vm0 = vmmov 0   ;;  %v266_v7 = vmov 1   ;;  %v267_v26 = vmov 1.0  }
  0x10   :  { %166 = vmatprep.subr.mxu0 %v264_v2  ;;  %30 = vperm.xlu0 %211, %v26_v3   ;;  %v57_v8 = vld [vmem:[#allocation2 + $0x60] sm:$0xff]  ;;  %v56_v9 = vld [vmem:[#allocation2 + $0x58] sm:$0xff]  ;;  %v55_v10 = vld [vmem:[#allocation2 + $0x50] sm:$0xff]  ;;  %v28_v23 = vand.u32 127, %v27_v21  ;;  %s268_s0 = smov [#allocation5]  }
  0x11   :  { %39 = vperm.xlu1 %213, %v26_v3   ;;  %167 = vmatpush3.msra.mxu0 %v60_v4  ;;  %v54_v11 = vld [vmem:[#allocation2 + $0x48] sm:$0xff]  ;;  %v53_v12 = vld [vmem:[#allocation2 + $0x40] sm:$0xff]  ;;  %v52_v13 = vld [vmem:[#allocation2 + $0x38] sm:$0xff]  ;;  %s138_s1 = sshll.u32 %s268_s0, 4  ;;  %s139_s1 = int_to_ptr.vmem [resolvable:$true] %s138_s1 }
  0x12   :  { %168 = vmatprep.subr.mxu0 %v264_v2  ;;  %198 = vmatprep.mubr.msk.f32.mxu0 %vm265_vm0, %v264_v2  ;;  %v51_v14 = vld [vmem:[#allocation2 + $0x30] sm:$0xff]  ;;  %v50_v15 = vld [vmem:[#allocation2 + $0x28] sm:$0xff]  ;;  %v49_v16 = vld [vmem:[#allocation2 + $0x20] sm:$0xff]  ;;  %s235_s18 = scalar_lea.vmem %s139_s1, 128  ;;  %p240_p6 = scmp.lt.s32.totalorder %s139_s1, %s139_s1 }
  0x13   :  { %169 = vmatpush3.msra.mxu0 %v59_v5  ;;  %v48_v17 = vld [vmem:[#allocation2 + $0x18] sm:$0xff]  ;;  %v47_v18 = vld [vmem:[#allocation2 + $0x10] sm:$0xff]  ;;  %v46_v19 = vld [vmem:[#allocation2 + $0x8] sm:$0xff]  ;;  %p236_p5 = scmp.ne.s32.totalorder %s139_s1, %s235_s18  ;;  %p241_p7 = scmp.lt.s32.totalorder %s235_s18, %s235_s18 }
  0x14   :  { %212 = vset.pattern.permute.xlu0 %v266_v7  ;;  %170 = vmatprep.subr.mxu0 %v264_v2  ;;  %v45_v20 = vld [vmem:[#allocation2] sm:$0xff] }
  0x15   :  { %34 = vperm.xlu0 %212, %v26_v3   ;;  %171 = vmatpush3.msra.mxu0 %v58_v6  ;;  %p242_p8 = por %p241_p7, %p240_p6 }
  0x16   :  { %172 = vmatprep.subr.mxu0 %v264_v2 }
  0x17   :  { %173 = vmatpush3.msra.mxu0 %v57_v8  ;;  %p243_p9 = pnand %p242_p8, %p236_p5 }
  0x18   :  { %174 = vmatprep.subr.mxu0 %v264_v2 }
  0x19   :  { %175 = vmatpush3.msra.mxu0 %v56_v9  ;;  %214 = vset.pattern.permute.xlu0 %v263_v1 }
  0x1a   :  { %176 = vmatprep.subr.mxu0 %v264_v2 }
  0x1b   :  { %177 = vmatpush3.msra.mxu0 %v55_v10 }
  0x1c   :  { %178 = vmatprep.subr.mxu0 %v264_v2 }
  0x1d   :  { %179 = vmatpush3.msra.mxu0 %v54_v11 }
  0x1e   :  { %180 = vmatprep.subr.mxu0 %v264_v2 }
  0x1f   :  { %181 = vmatpush3.msra.mxu0 %v53_v12 }
  0x20   :  { %182 = vmatprep.subr.mxu0 %v264_v2 }
  0x21   :  { %183 = vmatpush3.msra.mxu0 %v52_v13 }
  0x22   :  { %184 = vmatprep.subr.mxu0 %v264_v2 }
  0x23   :  { %185 = vmatpush3.msra.mxu0 %v51_v14 }
  0x24   :  { %186 = vmatprep.subr.mxu0 %v264_v2 }
  0x25   :  { %187 = vmatpush3.msra.mxu0 %v50_v15 }
  0x26   :  { %188 = vmatprep.subr.mxu0 %v264_v2 }
  0x27   :  { %189 = vmatpush3.msra.mxu0 %v49_v16 }
  0x28   :  { %190 = vmatprep.subr.mxu0 %v264_v2 }
  0x29   :  { %191 = vmatpush3.msra.mxu0 %v48_v17 }
  0x2a   :  { %192 = vmatprep.subr.mxu0 %v264_v2 }
  0x2b   :  { %193 = vmatpush3.msra.mxu0 %v47_v18 }
  0x2c   :  { %194 = vmatprep.subr.mxu0 %v264_v2 }
  0x2d   :  { %195 = vmatpush3.msra.mxu0 %v46_v19 }
  0x2e   :  { %196 = vmatprep.subr.mxu0 %v264_v2 }
  0x2f   :  { %197 = vmatpush3.msra.mxu0 %v45_v20 }
  0x8b   :  { %v31_v22 = vpop.permute.xlu0 %30 }
  0x8c   :  { %v40_v24 = vpop.permute.xlu1 %39  ;;  %vm32_vm2 = vcmp.eq.s32.totalorder %v28_v23, %v31_v22 }
  0x8d   :  { %vm41_vm1 = vcmp.eq.s32.totalorder %v28_v23, %v40_v24 }
  0x90   :  { %v35_v25 = vpop.permute.xlu0 %34 }
  0x91   :  { %vm36_vm3 = vcmp.eq.s32.totalorder %v28_v23, %v35_v25 }
  0x92   :  { %vm37_vm4 = vmor %vm32_vm2, %vm36_vm3 }
  0x93   :  { %vm42_vm5 = vmor %vm37_vm4, %vm41_vm1 }
  0x94   :  { %199 = vmatmul.mubr.msk.f32.vlgmr.msra.gmra.mxu0 %vm42_vm5, %v267_v26 }
 0x154   :  { %v127_v27 = vpop.f32.mrf.mxu0 }
 0x155   :  { %131 = vst [vmem:[#allocation5] sm:$0xff] %v127_v27 }
 0x156   :  { %v200_v28 = vpop.f32.mrf.mxu0 }
 0x157   :  { %246 = shalt.err (!%p243_p9)
}
 0x158   :  { %141 = dma.vmem_to_hbm [thread:$0]  %s139_s1, 128, %s295_s2, [#allocation4]  }
 0x159   :  { %257 = dma.done.wait [#allocation4], 128  }
 0x15a   :  { %258 = vsyncadd [#allocation4], 4294967168 }
 0x15b   :  { %145 = vsyncpa [#allocation3], 1 }
 0x15c   :  { %146 = vsyncpa [#allocation4], 1 }

</bundles_post_ra>
